<compile_context>
chip_gen: v6e
topology: v6e:2x2x1
jax: 0.10.0
libtpu: 0.0.40
codegen_flags: <defaults>
</compile_context>

<pallas_src>
import jax
import jax.numpy as jnp
from jax.experimental import pallas as pl
from jax.experimental.pallas import tpu as pltpu


def _rnn_lstm_kernel(xb_ref, whh_ref, wfc_ref, bfc_ref, out_ref, cstk_ref):
    # xb_ref : (T, B, 4H)  precomputed x_t * W_ih^T + (b_ih + b_hh)
    # whh_ref: (H, 4H)     W_hh^T
    # wfc_ref: (H, C)      W_fc^T
    # bfc_ref: (1, C)
    # out_ref: (T*B, C)    t-major stacked FC(c_t)
    # cstk_ref: (T*B, H)   VMEM scratch staging the c_t states
    T, B, _ = xb_ref.shape
    H = whh_ref.shape[0]

    h = jnp.zeros((B, H), jnp.float32)
    c = jnp.zeros((B, H), jnp.float32)

    # Static unrolled recurrence; h/c live in vregs across iterations.
    for t in range(T):
        gates = xb_ref[t] + jnp.dot(h, whh_ref[...],
                                    preferred_element_type=jnp.float32)   # (B, 4H)
        sg = jax.nn.sigmoid(gates)          # one EUP pass over the whole gates vreg
        i_g = sg[:, 0:H]
        f_g = sg[:, H:2 * H]
        o_g = sg[:, 3 * H:4 * H]
        g_g = jnp.tanh(gates[:, 2 * H:3 * H])

        c = f_g * c + i_g * g_g
        h = o_g * jnp.tanh(c)

        # Stage c_t (t-major) for the batched FC after the loop; static slice.
        cstk_ref[t * B:(t + 1) * B, :] = c

    # One batched FC over all timesteps: (T*B, H) @ (H, C) + bias, single store.
    y = jnp.dot(cstk_ref[...], wfc_ref[...],
                preferred_element_type=jnp.float32) + bfc_ref[...]
    out_ref[...] = y.astype(out_ref.dtype)


def rnn_lstm_forward(x, w_ih, w_hh, b_ih, b_hh, w_fc, b_fc):
    """x: (B, T) float32 (input_size == 1 per the PyTorch forward).
    Returns (B, T, num_classes)."""
    B, T = x.shape
    H = w_hh.shape[1]
    C = w_fc.shape[0]

    x = x.astype(jnp.float32)
    wih_row = jnp.asarray(w_ih, jnp.float32)[:, 0]                 # (4H,)  input_size == 1
    bias = (jnp.asarray(b_ih, jnp.float32)
            + jnp.asarray(b_hh, jnp.float32))                      # (4H,)
    # Precompute the full input contribution once in XLA: (T, B, 4H).
    xb = x.T[:, :, None] * wih_row[None, None, :] + bias[None, None, :]

    whh_t = jnp.asarray(w_hh, jnp.float32).T                       # (H, 4H)
    wfc_t = jnp.asarray(w_fc, jnp.float32).T                       # (H, C)
    bfc = jnp.asarray(b_fc, jnp.float32)[None, :]                  # (1, C)

    out_flat = pl.pallas_call(
        _rnn_lstm_kernel,
        out_shape=jax.ShapeDtypeStruct((T * B, C), jnp.float32),
        grid_spec=pltpu.PrefetchScalarGridSpec(
            num_scalar_prefetch=0,
            grid=(1,),
            in_specs=[
                pl.BlockSpec((T, B, 4 * H), lambda i: (0, 0, 0)),  # xb
                pl.BlockSpec((H, 4 * H), lambda i: (0, 0)),        # W_hh^T
                pl.BlockSpec((H, C), lambda i: (0, 0)),            # W_fc^T
                pl.BlockSpec((1, C), lambda i: (0, 0)),            # b_fc
            ],
            out_specs=pl.BlockSpec((T * B, C), lambda i: (0, 0)),
            scratch_shapes=[pltpu.VMEM((T * B, H), jnp.float32)],  # staged c_t states
        ),
        compiler_params=pltpu.CompilerParams(dimension_semantics=("arbitrary",)),
    )(xb, whh_t, wfc_t, bfc)

    # (T*B, C) t-major -> (B, T, C); tiny XLA reshuffle outside the kernel.
    return jnp.transpose(out_flat.reshape(T, B, C), (1, 0, 2))


def rnn_lstm_reference(x, w_ih, w_hh, b_ih, b_hh, w_fc, b_fc):
    """Pure-JAX reference mirroring the PyTorch forward."""
    B, T = x.shape
    H = w_hh.shape[1]

    def step(carry, x_t):
        h, c = carry
        gates = x_t[:, None] @ w_ih.T + h @ w_hh.T + b_ih + b_hh
        i, f, g, o = jnp.split(gates, 4, axis=1)
        i = jax.nn.sigmoid(i)
        f = jax.nn.sigmoid(f)
        g = jnp.tanh(g)
        o = jax.nn.sigmoid(o)
        c_new = f * c + i * g
        h_new = o * jnp.tanh(c_new)
        return (h_new, c_new), c_new

    init = (jnp.zeros((B, H), jnp.float32), jnp.zeros((B, H), jnp.float32))
    _, cs = jax.lax.scan(step, init, jnp.transpose(x))       # cs: (T, B, H)
    outputs = jnp.transpose(cs, (1, 0, 2))                    # (B, T, H)
    out = outputs.reshape(B * T, H) @ w_fc.T + b_fc
    return out.reshape(B, T, -1)


if __name__ == "__main__":
    # Small shapes implied by the module: input_size = 1 (scalar per timestep).
    B, T = 2, 8
    input_size, hidden_size, num_classes = 1, 32, 4

    key = jax.random.PRNGKey(0)
    k = jax.random.split(key, 7)
    bound = 1.0 / jnp.sqrt(hidden_size)

    # Deterministic parameter init (PyTorch LSTMCell/Linear layout).
    w_ih = jax.random.uniform(k[0], (4 * hidden_size, input_size), jnp.float32, -bound, bound)
    w_hh = jax.random.uniform(k[1], (4 * hidden_size, hidden_size), jnp.float32, -bound, bound)
    b_ih = jax.random.uniform(k[2], (4 * hidden_size,), jnp.float32, -bound, bound)
    b_hh = jax.random.uniform(k[3], (4 * hidden_size,), jnp.float32, -bound, bound)
    w_fc = jax.random.uniform(k[4], (num_classes, hidden_size), jnp.float32, -bound, bound)
    b_fc = jax.random.uniform(k[5], (num_classes,), jnp.float32, -bound, bound)

    x = jax.random.normal(k[6], (B, T), jnp.float32)

    out = rnn_lstm_forward(x, w_ih, w_hh, b_ih, b_hh, w_fc, b_fc)
    out = jax.block_until_ready(out)

    ref = rnn_lstm_reference(x, w_ih, w_hh, b_ih, b_hh, w_fc, b_fc)
    assert out.shape == (B, T, num_classes), out.shape
    assert jnp.allclose(out, ref, atol=1e-5, rtol=1e-5), float(jnp.max(jnp.abs(out - ref)))

    print("KERNEL_OK")
</pallas_src>

<mosaic_0001>
module attributes {stable_mosaic.version = 11 : i64} {
  func.func @_rnn_lstm_kernel(%arg0: i32, %arg1: memref<8x2x128xf32, #tpu.memory_space<vmem>>, %arg2: memref<32x128xf32, #tpu.memory_space<vmem>>, %arg3: memref<32x4xf32, #tpu.memory_space<vmem>>, %arg4: memref<1x4xf32, #tpu.memory_space<vmem>>, %arg5: memref<16x4xf32, #tpu.memory_space<vmem>>, %arg6: memref<16x32xf32, #tpu.memory_space<vmem>>) attributes {dimension_semantics = [#tpu.dimension_semantics<arbitrary>], iteration_bounds = array<i64: 1>, scalar_prefetch = 0 : i64, scratch_operands = 1 : i64, tpu.core_type = #tpu.core_type<tc>, window_params = [{pipeline_mode = #tpu.pipeline_mode<synchronous>, transform_indices = @transform_0, window_bounds = array<i64: 8, 2, 128>}, {pipeline_mode = #tpu.pipeline_mode<synchronous>, transform_indices = @transform_1, window_bounds = array<i64: 32, 128>}, {pipeline_mode = #tpu.pipeline_mode<synchronous>, transform_indices = @transform_2, window_bounds = array<i64: 32, 4>}, {pipeline_mode = #tpu.pipeline_mode<synchronous>, transform_indices = @transform_3, window_bounds = array<i64: 1, 4>}, {pipeline_mode = #tpu.pipeline_mode<synchronous>, transform_indices = @transform_4, window_bounds = array<i64: 16, 4>}]} {
    %cst = arith.constant 0.000000e+00 : f32
    %0 = vector.broadcast %cst : f32 to vector<2x32xf32>
    %cst_0 = arith.constant 0.000000e+00 : f32
    %1 = vector.broadcast %cst_0 : f32 to vector<2x32xf32>
    %c0 = arith.constant 0 : index
    %c0_1 = arith.constant 0 : index
    %c0_2 = arith.constant 0 : index
    %2 = vector.load %arg1[%c0, %c0_1, %c0_2] : memref<8x2x128xf32, #tpu.memory_space<vmem>>, vector<1x2x128xf32>
    %3 = vector.shape_cast %2 : vector<1x2x128xf32> to vector<2x128xf32>
    %c0_3 = arith.constant 0 : index
    %c0_4 = arith.constant 0 : index
    %4 = vector.load %arg2[%c0_3, %c0_4] : memref<32x128xf32, #tpu.memory_space<vmem>>, vector<32x128xf32>
    %cst_5 = arith.constant dense<0.000000e+00> : vector<2x128xf32>
    %5 = tpu.matmul %0, %4, %cst_5 {dimension_numbers = #tpu.dot_dimension_numbers<[1], [0], [0], [1], [0, 0, 1, 1], [], []>} : vector<2x32xf32>, vector<32x128xf32>, vector<2x128xf32> -> vector<2x128xf32>
    %6 = arith.addf %3, %5 : vector<2x128xf32>
    %7 = arith.negf %6 : vector<2x128xf32>
    %8 = math.exp %7 : vector<2x128xf32>
    %cst_6 = arith.constant 1.000000e+00 : f32
    %9 = vector.broadcast %cst_6 : f32 to vector<2x128xf32>
    %10 = arith.addf %9, %8 : vector<2x128xf32>
    %11 = arith.divf %9, %10 : vector<2x128xf32>
    %12 = vector.extract_strided_slice %11 {offsets = [0, 0], sizes = [2, 32], strides = [1, 1]} : vector<2x128xf32> to vector<2x32xf32>
    %13 = vector.extract_strided_slice %11 {offsets = [0, 32], sizes = [2, 32], strides = [1, 1]} : vector<2x128xf32> to vector<2x32xf32>
    %14 = vector.extract_strided_slice %11 {offsets = [0, 96], sizes = [2, 32], strides = [1, 1]} : vector<2x128xf32> to vector<2x32xf32>
    %15 = vector.extract_strided_slice %6 {offsets = [0, 64], sizes = [2, 32], strides = [1, 1]} : vector<2x128xf32> to vector<2x32xf32>
    %16 = math.tanh %15 : vector<2x32xf32>
    %17 = arith.mulf %13, %1 : vector<2x32xf32>
    %18 = arith.mulf %12, %16 : vector<2x32xf32>
    %19 = arith.addf %17, %18 : vector<2x32xf32>
    %20 = math.tanh %19 : vector<2x32xf32>
    %21 = arith.mulf %14, %20 : vector<2x32xf32>
    %c0_7 = arith.constant 0 : index
    %c0_8 = arith.constant 0 : index
    %22 = vector.load %arg6[%c0_7, %c0_8] : memref<16x32xf32, #tpu.memory_space<vmem>>, vector<2x32xf32>
    tpu.vector_store %arg6[%c0_7, %c0_8], %19 {strides = array<i32>} : memref<16x32xf32, #tpu.memory_space<vmem>>, vector<2x32xf32>,
    %c1 = arith.constant 1 : index
    %c0_9 = arith.constant 0 : index
    %c0_10 = arith.constant 0 : index
    %23 = vector.load %arg1[%c1, %c0_9, %c0_10] : memref<8x2x128xf32, #tpu.memory_space<vmem>>, vector<1x2x128xf32>
    %24 = vector.shape_cast %23 : vector<1x2x128xf32> to vector<2x128xf32>
    %c0_11 = arith.constant 0 : index
    %c0_12 = arith.constant 0 : index
    %25 = vector.load %arg2[%c0_11, %c0_12] : memref<32x128xf32, #tpu.memory_space<vmem>>, vector<32x128xf32>
    %cst_13 = arith.constant dense<0.000000e+00> : vector<2x128xf32>
    %26 = tpu.matmul %21, %25, %cst_13 {dimension_numbers = #tpu.dot_dimension_numbers<[1], [0], [0], [1], [0, 0, 1, 1], [], []>} : vector<2x32xf32>, vector<32x128xf32>, vector<2x128xf32> -> vector<2x128xf32>
    %27 = arith.addf %24, %26 : vector<2x128xf32>
    %28 = arith.negf %27 : vector<2x128xf32>
    %29 = math.exp %28 : vector<2x128xf32>
    %cst_14 = arith.constant 1.000000e+00 : f32
    %30 = vector.broadcast %cst_14 : f32 to vector<2x128xf32>
    %31 = arith.addf %30, %29 : vector<2x128xf32>
    %32 = arith.divf %30, %31 : vector<2x128xf32>
    %33 = vector.extract_strided_slice %32 {offsets = [0, 0], sizes = [2, 32], strides = [1, 1]} : vector<2x128xf32> to vector<2x32xf32>
    %34 = vector.extract_strided_slice %32 {offsets = [0, 32], sizes = [2, 32], strides = [1, 1]} : vector<2x128xf32> to vector<2x32xf32>
    %35 = vector.extract_strided_slice %32 {offsets = [0, 96], sizes = [2, 32], strides = [1, 1]} : vector<2x128xf32> to vector<2x32xf32>
    %36 = vector.extract_strided_slice %27 {offsets = [0, 64], sizes = [2, 32], strides = [1, 1]} : vector<2x128xf32> to vector<2x32xf32>
    %37 = math.tanh %36 : vector<2x32xf32>
    %38 = arith.mulf %34, %19 : vector<2x32xf32>
    %39 = arith.mulf %33, %37 : vector<2x32xf32>
    %40 = arith.addf %38, %39 : vector<2x32xf32>
    %41 = math.tanh %40 : vector<2x32xf32>
    %42 = arith.mulf %35, %41 : vector<2x32xf32>
    %c2 = arith.constant 2 : index
    %c0_15 = arith.constant 0 : index
    %43 = vector.load %arg6[%c2, %c0_15] : memref<16x32xf32, #tpu.memory_space<vmem>>, vector<2x32xf32>
    tpu.vector_store %arg6[%c2, %c0_15], %40 {strides = array<i32>} : memref<16x32xf32, #tpu.memory_space<vmem>>, vector<2x32xf32>,
    %c2_16 = arith.constant 2 : index
    %c0_17 = arith.constant 0 : index
    %c0_18 = arith.constant 0 : index
    %44 = vector.load %arg1[%c2_16, %c0_17, %c0_18] : memref<8x2x128xf32, #tpu.memory_space<vmem>>, vector<1x2x128xf32>
    %45 = vector.shape_cast %44 : vector<1x2x128xf32> to vector<2x128xf32>
    %c0_19 = arith.constant 0 : index
    %c0_20 = arith.constant 0 : index
    %46 = vector.load %arg2[%c0_19, %c0_20] : memref<32x128xf32, #tpu.memory_space<vmem>>, vector<32x128xf32>
    %cst_21 = arith.constant dense<0.000000e+00> : vector<2x128xf32>
    %47 = tpu.matmul %42, %46, %cst_21 {dimension_numbers = #tpu.dot_dimension_numbers<[1], [0], [0], [1], [0, 0, 1, 1], [], []>} : vector<2x32xf32>, vector<32x128xf32>, vector<2x128xf32> -> vector<2x128xf32>
    %48 = arith.addf %45, %47 : vector<2x128xf32>
    %49 = arith.negf %48 : vector<2x128xf32>
    %50 = math.exp %49 : vector<2x128xf32>
    %cst_22 = arith.constant 1.000000e+00 : f32
    %51 = vector.broadcast %cst_22 : f32 to vector<2x128xf32>
    %52 = arith.addf %51, %50 : vector<2x128xf32>
    %53 = arith.divf %51, %52 : vector<2x128xf32>
    %54 = vector.extract_strided_slice %53 {offsets = [0, 0], sizes = [2, 32], strides = [1, 1]} : vector<2x128xf32> to vector<2x32xf32>
    %55 = vector.extract_strided_slice %53 {offsets = [0, 32], sizes = [2, 32], strides = [1, 1]} : vector<2x128xf32> to vector<2x32xf32>
    %56 = vector.extract_strided_slice %53 {offsets = [0, 96], sizes = [2, 32], strides = [1, 1]} : vector<2x128xf32> to vector<2x32xf32>
    %57 = vector.extract_strided_slice %48 {offsets = [0, 64], sizes = [2, 32], strides = [1, 1]} : vector<2x128xf32> to vector<2x32xf32>
    %58 = math.tanh %57 : vector<2x32xf32>
    %59 = arith.mulf %55, %40 : vector<2x32xf32>
    %60 = arith.mulf %54, %58 : vector<2x32xf32>
    %61 = arith.addf %59, %60 : vector<2x32xf32>
    %62 = math.tanh %61 : vector<2x32xf32>
    %63 = arith.mulf %56, %62 : vector<2x32xf32>
    %c4 = arith.constant 4 : index
    %c0_23 = arith.constant 0 : index
    %64 = vector.load %arg6[%c4, %c0_23] : memref<16x32xf32, #tpu.memory_space<vmem>>, vector<2x32xf32>
    tpu.vector_store %arg6[%c4, %c0_23], %61 {strides = array<i32>} : memref<16x32xf32, #tpu.memory_space<vmem>>, vector<2x32xf32>,
    %c3 = arith.constant 3 : index
    %c0_24 = arith.constant 0 : index
    %c0_25 = arith.constant 0 : index
    %65 = vector.load %arg1[%c3, %c0_24, %c0_25] : memref<8x2x128xf32, #tpu.memory_space<vmem>>, vector<1x2x128xf32>
    %66 = vector.shape_cast %65 : vector<1x2x128xf32> to vector<2x128xf32>
    %c0_26 = arith.constant 0 : index
    %c0_27 = arith.constant 0 : index
    %67 = vector.load %arg2[%c0_26, %c0_27] : memref<32x128xf32, #tpu.memory_space<vmem>>, vector<32x128xf32>
    %cst_28 = arith.constant dense<0.000000e+00> : vector<2x128xf32>
    %68 = tpu.matmul %63, %67, %cst_28 {dimension_numbers = #tpu.dot_dimension_numbers<[1], [0], [0], [1], [0, 0, 1, 1], [], []>} : vector<2x32xf32>, vector<32x128xf32>, vector<2x128xf32> -> vector<2x128xf32>
    %69 = arith.addf %66, %68 : vector<2x128xf32>
    %70 = arith.negf %69 : vector<2x128xf32>
    %71 = math.exp %70 : vector<2x128xf32>
    %cst_29 = arith.constant 1.000000e+00 : f32
    %72 = vector.broadcast %cst_29 : f32 to vector<2x128xf32>
    %73 = arith.addf %72, %71 : vector<2x128xf32>
    %74 = arith.divf %72, %73 : vector<2x128xf32>
    %75 = vector.extract_strided_slice %74 {offsets = [0, 0], sizes = [2, 32], strides = [1, 1]} : vector<2x128xf32> to vector<2x32xf32>
    %76 = vector.extract_strided_slice %74 {offsets = [0, 32], sizes = [2, 32], strides = [1, 1]} : vector<2x128xf32> to vector<2x32xf32>
    %77 = vector.extract_strided_slice %74 {offsets = [0, 96], sizes = [2, 32], strides = [1, 1]} : vector<2x128xf32> to vector<2x32xf32>
    %78 = vector.extract_strided_slice %69 {offsets = [0, 64], sizes = [2, 32], strides = [1, 1]} : vector<2x128xf32> to vector<2x32xf32>
    %79 = math.tanh %78 : vector<2x32xf32>
    %80 = arith.mulf %76, %61 : vector<2x32xf32>
    %81 = arith.mulf %75, %79 : vector<2x32xf32>
    %82 = arith.addf %80, %81 : vector<2x32xf32>
    %83 = math.tanh %82 : vector<2x32xf32>
    %84 = arith.mulf %77, %83 : vector<2x32xf32>
    %c6 = arith.constant 6 : index
    %c0_30 = arith.constant 0 : index
    %85 = vector.load %arg6[%c6, %c0_30] : memref<16x32xf32, #tpu.memory_space<vmem>>, vector<2x32xf32>
    tpu.vector_store %arg6[%c6, %c0_30], %82 {strides = array<i32>} : memref<16x32xf32, #tpu.memory_space<vmem>>, vector<2x32xf32>,
    %c4_31 = arith.constant 4 : index
    %c0_32 = arith.constant 0 : index
    %c0_33 = arith.constant 0 : index
    %86 = vector.load %arg1[%c4_31, %c0_32, %c0_33] : memref<8x2x128xf32, #tpu.memory_space<vmem>>, vector<1x2x128xf32>
    %87 = vector.shape_cast %86 : vector<1x2x128xf32> to vector<2x128xf32>
    %c0_34 = arith.constant 0 : index
    %c0_35 = arith.constant 0 : index
    %88 = vector.load %arg2[%c0_34, %c0_35] : memref<32x128xf32, #tpu.memory_space<vmem>>, vector<32x128xf32>
    %cst_36 = arith.constant dense<0.000000e+00> : vector<2x128xf32>
    %89 = tpu.matmul %84, %88, %cst_36 {dimension_numbers = #tpu.dot_dimension_numbers<[1], [0], [0], [1], [0, 0, 1, 1], [], []>} : vector<2x32xf32>, vector<32x128xf32>, vector<2x128xf32> -> vector<2x128xf32>
    %90 = arith.addf %87, %89 : vector<2x128xf32>
    %91 = arith.negf %90 : vector<2x128xf32>
    %92 = math.exp %91 : vector<2x128xf32>
    %cst_37 = arith.constant 1.000000e+00 : f32
    %93 = vector.broadcast %cst_37 : f32 to vector<2x128xf32>
    %94 = arith.addf %93, %92 : vector<2x128xf32>
    %95 = arith.divf %93, %94 : vector<2x128xf32>
    %96 = vector.extract_strided_slice %95 {offsets = [0, 0], sizes = [2, 32], strides = [1, 1]} : vector<2x128xf32> to vector<2x32xf32>
    %97 = vector.extract_strided_slice %95 {offsets = [0, 32], sizes = [2, 32], strides = [1, 1]} : vector<2x128xf32> to vector<2x32xf32>
    %98 = vector.extract_strided_slice %95 {offsets = [0, 96], sizes = [2, 32], strides = [1, 1]} : vector<2x128xf32> to vector<2x32xf32>
    %99 = vector.extract_strided_slice %90 {offsets = [0, 64], sizes = [2, 32], strides = [1, 1]} : vector<2x128xf32> to vector<2x32xf32>
    %100 = math.tanh %99 : vector<2x32xf32>
    %101 = arith.mulf %97, %82 : vector<2x32xf32>
    %102 = arith.mulf %96, %100 : vector<2x32xf32>
    %103 = arith.addf %101, %102 : vector<2x32xf32>
    %104 = math.tanh %103 : vector<2x32xf32>
    %105 = arith.mulf %98, %104 : vector<2x32xf32>
    %c8 = arith.constant 8 : index
    %c0_38 = arith.constant 0 : index
    %106 = vector.load %arg6[%c8, %c0_38] : memref<16x32xf32, #tpu.memory_space<vmem>>, vector<2x32xf32>
    tpu.vector_store %arg6[%c8, %c0_38], %103 {strides = array<i32>} : memref<16x32xf32, #tpu.memory_space<vmem>>, vector<2x32xf32>,
    %c5 = arith.constant 5 : index
    %c0_39 = arith.constant 0 : index
    %c0_40 = arith.constant 0 : index
    %107 = vector.load %arg1[%c5, %c0_39, %c0_40] : memref<8x2x128xf32, #tpu.memory_space<vmem>>, vector<1x2x128xf32>
    %108 = vector.shape_cast %107 : vector<1x2x128xf32> to vector<2x128xf32>
    %c0_41 = arith.constant 0 : index
    %c0_42 = arith.constant 0 : index
    %109 = vector.load %arg2[%c0_41, %c0_42] : memref<32x128xf32, #tpu.memory_space<vmem>>, vector<32x128xf32>
    %cst_43 = arith.constant dense<0.000000e+00> : vector<2x128xf32>
    %110 = tpu.matmul %105, %109, %cst_43 {dimension_numbers = #tpu.dot_dimension_numbers<[1], [0], [0], [1], [0, 0, 1, 1], [], []>} : vector<2x32xf32>, vector<32x128xf32>, vector<2x128xf32> -> vector<2x128xf32>
    %111 = arith.addf %108, %110 : vector<2x128xf32>
    %112 = arith.negf %111 : vector<2x128xf32>
    %113 = math.exp %112 : vector<2x128xf32>
    %cst_44 = arith.constant 1.000000e+00 : f32
    %114 = vector.broadcast %cst_44 : f32 to vector<2x128xf32>
    %115 = arith.addf %114, %113 : vector<2x128xf32>
    %116 = arith.divf %114, %115 : vector<2x128xf32>
    %117 = vector.extract_strided_slice %116 {offsets = [0, 0], sizes = [2, 32], strides = [1, 1]} : vector<2x128xf32> to vector<2x32xf32>
    %118 = vector.extract_strided_slice %116 {offsets = [0, 32], sizes = [2, 32], strides = [1, 1]} : vector<2x128xf32> to vector<2x32xf32>
    %119 = vector.extract_strided_slice %116 {offsets = [0, 96], sizes = [2, 32], strides = [1, 1]} : vector<2x128xf32> to vector<2x32xf32>
    %120 = vector.extract_strided_slice %111 {offsets = [0, 64], sizes = [2, 32], strides = [1, 1]} : vector<2x128xf32> to vector<2x32xf32>
    %121 = math.tanh %120 : vector<2x32xf32>
    %122 = arith.mulf %118, %103 : vector<2x32xf32>
    %123 = arith.mulf %117, %121 : vector<2x32xf32>
    %124 = arith.addf %122, %123 : vector<2x32xf32>
    %125 = math.tanh %124 : vector<2x32xf32>
    %126 = arith.mulf %119, %125 : vector<2x32xf32>
    %c10 = arith.constant 10 : index
    %c0_45 = arith.constant 0 : index
    %127 = vector.load %arg6[%c10, %c0_45] : memref<16x32xf32, #tpu.memory_space<vmem>>, vector<2x32xf32>
    tpu.vector_store %arg6[%c10, %c0_45], %124 {strides = array<i32>} : memref<16x32xf32, #tpu.memory_space<vmem>>, vector<2x32xf32>,
    %c6_46 = arith.constant 6 : index
    %c0_47 = arith.constant 0 : index
    %c0_48 = arith.constant 0 : index
    %128 = vector.load %arg1[%c6_46, %c0_47, %c0_48] : memref<8x2x128xf32, #tpu.memory_space<vmem>>, vector<1x2x128xf32>
    %129 = vector.shape_cast %128 : vector<1x2x128xf32> to vector<2x128xf32>
    %c0_49 = arith.constant 0 : index
    %c0_50 = arith.constant 0 : index
    %130 = vector.load %arg2[%c0_49, %c0_50] : memref<32x128xf32, #tpu.memory_space<vmem>>, vector<32x128xf32>
    %cst_51 = arith.constant dense<0.000000e+00> : vector<2x128xf32>
    %131 = tpu.matmul %126, %130, %cst_51 {dimension_numbers = #tpu.dot_dimension_numbers<[1], [0], [0], [1], [0, 0, 1, 1], [], []>} : vector<2x32xf32>, vector<32x128xf32>, vector<2x128xf32> -> vector<2x128xf32>
    %132 = arith.addf %129, %131 : vector<2x128xf32>
    %133 = arith.negf %132 : vector<2x128xf32>
    %134 = math.exp %133 : vector<2x128xf32>
    %cst_52 = arith.constant 1.000000e+00 : f32
    %135 = vector.broadcast %cst_52 : f32 to vector<2x128xf32>
    %136 = arith.addf %135, %134 : vector<2x128xf32>
    %137 = arith.divf %135, %136 : vector<2x128xf32>
    %138 = vector.extract_strided_slice %137 {offsets = [0, 0], sizes = [2, 32], strides = [1, 1]} : vector<2x128xf32> to vector<2x32xf32>
    %139 = vector.extract_strided_slice %137 {offsets = [0, 32], sizes = [2, 32], strides = [1, 1]} : vector<2x128xf32> to vector<2x32xf32>
    %140 = vector.extract_strided_slice %137 {offsets = [0, 96], sizes = [2, 32], strides = [1, 1]} : vector<2x128xf32> to vector<2x32xf32>
    %141 = vector.extract_strided_slice %132 {offsets = [0, 64], sizes = [2, 32], strides = [1, 1]} : vector<2x128xf32> to vector<2x32xf32>
    %142 = math.tanh %141 : vector<2x32xf32>
    %143 = arith.mulf %139, %124 : vector<2x32xf32>
    %144 = arith.mulf %138, %142 : vector<2x32xf32>
    %145 = arith.addf %143, %144 : vector<2x32xf32>
    %146 = math.tanh %145 : vector<2x32xf32>
    %147 = arith.mulf %140, %146 : vector<2x32xf32>
    %c12 = arith.constant 12 : index
    %c0_53 = arith.constant 0 : index
    %148 = vector.load %arg6[%c12, %c0_53] : memref<16x32xf32, #tpu.memory_space<vmem>>, vector<2x32xf32>
    tpu.vector_store %arg6[%c12, %c0_53], %145 {strides = array<i32>} : memref<16x32xf32, #tpu.memory_space<vmem>>, vector<2x32xf32>,
    %c7 = arith.constant 7 : index
    %c0_54 = arith.constant 0 : index
    %c0_55 = arith.constant 0 : index
    %149 = vector.load %arg1[%c7, %c0_54, %c0_55] : memref<8x2x128xf32, #tpu.memory_space<vmem>>, vector<1x2x128xf32>
    %150 = vector.shape_cast %149 : vector<1x2x128xf32> to vector<2x128xf32>
    %c0_56 = arith.constant 0 : index
    %c0_57 = arith.constant 0 : index
    %151 = vector.load %arg2[%c0_56, %c0_57] : memref<32x128xf32, #tpu.memory_space<vmem>>, vector<32x128xf32>
    %cst_58 = arith.constant dense<0.000000e+00> : vector<2x128xf32>
    %152 = tpu.matmul %147, %151, %cst_58 {dimension_numbers = #tpu.dot_dimension_numbers<[1], [0], [0], [1], [0, 0, 1, 1], [], []>} : vector<2x32xf32>, vector<32x128xf32>, vector<2x128xf32> -> vector<2x128xf32>
    %153 = arith.addf %150, %152 : vector<2x128xf32>
    %154 = arith.negf %153 : vector<2x128xf32>
    %155 = math.exp %154 : vector<2x128xf32>
    %cst_59 = arith.constant 1.000000e+00 : f32
    %156 = vector.broadcast %cst_59 : f32 to vector<2x128xf32>
    %157 = arith.addf %156, %155 : vector<2x128xf32>
    %158 = arith.divf %156, %157 : vector<2x128xf32>
    %159 = vector.extract_strided_slice %158 {offsets = [0, 0], sizes = [2, 32], strides = [1, 1]} : vector<2x128xf32> to vector<2x32xf32>
    %160 = vector.extract_strided_slice %158 {offsets = [0, 32], sizes = [2, 32], strides = [1, 1]} : vector<2x128xf32> to vector<2x32xf32>
    %161 = vector.extract_strided_slice %153 {offsets = [0, 64], sizes = [2, 32], strides = [1, 1]} : vector<2x128xf32> to vector<2x32xf32>
    %162 = math.tanh %161 : vector<2x32xf32>
    %163 = arith.mulf %160, %145 : vector<2x32xf32>
    %164 = arith.mulf %159, %162 : vector<2x32xf32>
    %165 = arith.addf %163, %164 : vector<2x32xf32>
    %c14 = arith.constant 14 : index
    %c0_60 = arith.constant 0 : index
    %166 = vector.load %arg6[%c14, %c0_60] : memref<16x32xf32, #tpu.memory_space<vmem>>, vector<2x32xf32>
    tpu.vector_store %arg6[%c14, %c0_60], %165 {strides = array<i32>} : memref<16x32xf32, #tpu.memory_space<vmem>>, vector<2x32xf32>,
    %c0_61 = arith.constant 0 : index
    %c0_62 = arith.constant 0 : index
    %167 = vector.load %arg6[%c0_61, %c0_62] : memref<16x32xf32, #tpu.memory_space<vmem>>, vector<16x32xf32>
    %c0_63 = arith.constant 0 : index
    %c0_64 = arith.constant 0 : index
    %168 = vector.load %arg3[%c0_63, %c0_64] : memref<32x4xf32, #tpu.memory_space<vmem>>, vector<32x4xf32>
    %cst_65 = arith.constant dense<0.000000e+00> : vector<16x4xf32>
    %169 = tpu.matmul %167, %168, %cst_65 {dimension_numbers = #tpu.dot_dimension_numbers<[1], [0], [0], [1], [0, 0, 1, 1], [], []>} : vector<16x32xf32>, vector<32x4xf32>, vector<16x4xf32> -> vector<16x4xf32>
    %c0_66 = arith.constant 0 : index
    %c0_67 = arith.constant 0 : index
    %170 = vector.load %arg4[%c0_66, %c0_67] : memref<1x4xf32, #tpu.memory_space<vmem>>, vector<1x4xf32>
    %171 = vector.broadcast %170 : vector<1x4xf32> to vector<16x4xf32>
    %172 = arith.addf %169, %171 : vector<16x4xf32>
    %c0_68 = arith.constant 0 : index
    %c0_69 = arith.constant 0 : index
    %173 = vector.load %arg5[%c0_68, %c0_69] : memref<16x4xf32, #tpu.memory_space<vmem>>, vector<16x4xf32>
    tpu.vector_store %arg5[%c0_68, %c0_69], %172 {strides = array<i32>} : memref<16x4xf32, #tpu.memory_space<vmem>>, vector<16x4xf32>,
    return
  }
  func.func @transform_0(%arg0: i32) -> (i32, i32, i32) {
    %c0_i32 = arith.constant 0 : i32
    %c0_i32_0 = arith.constant 0 : i32
    %c0_i32_1 = arith.constant 0 : i32
    %c0_i32_2 = arith.constant 0 : i32
    return %c0_i32, %c0_i32_0, %c0_i32_1 : i32, i32, i32
  }
  func.func @transform_1(%arg0: i32) -> (i32, i32) {
    %c0_i32 = arith.constant 0 : i32
    %c0_i32_0 = arith.constant 0 : i32
    %c0_i32_1 = arith.constant 0 : i32
    return %c0_i32, %c0_i32_0 : i32, i32
  }
  func.func @transform_2(%arg0: i32) -> (i32, i32) {
    %c0_i32 = arith.constant 0 : i32
    %c0_i32_0 = arith.constant 0 : i32
    %c0_i32_1 = arith.constant 0 : i32
    return %c0_i32, %c0_i32_0 : i32, i32
  }
  func.func @transform_3(%arg0: i32) -> (i32, i32) {
    %c0_i32 = arith.constant 0 : i32
    %c0_i32_0 = arith.constant 0 : i32
    %c0_i32_1 = arith.constant 0 : i32
    return %c0_i32, %c0_i32_0 : i32, i32
  }
  func.func @transform_4(%arg0: i32) -> (i32, i32) {
    %c0_i32 = arith.constant 0 : i32
    %c0_i32_0 = arith.constant 0 : i32
    %c0_i32_1 = arith.constant 0 : i32
    return %c0_i32, %c0_i32_0 : i32, i32
  }
}

</mosaic_0001>

<bundles_post_ra>
// kernel: tpu_custom_call.1
= control target key start
LH: loop header
LB: loop body
LE: loop exit
PB: predicated region body
PF: predicated region fallthrough
CT: control target
= control target key end

     0   :  { %9 = vsyncpa [#allocation4], 0  ;;  %s1268_s15 = smov [#allocation3]   ;;  %s1512_s0 = inlined_call_operand.hbm [shape: f32[8,2,128], index: 0, kind: input, shape index: {}]   ;;  %s1513_s1 = inlined_call_operand.vmem [shape: f32[32,128], index: 1, kind: input, shape index: {}]   ;;  %s1514_s2 = inlined_call_operand.vmem [shape: f32[32,4], index: 2, kind: input, shape index: {}]   ;;  %s1515_s3 = inlined_call_operand.vmem [shape: f32[1,4], index: 3, kind: input, shape index: {}]   ;;  %s1516_s4 = inlined_call_operand.vmem [shape: f32[16,4], index: 4, kind: output, shape index: {}]  }
   0x1   :  { %s15_s16 = sshll.u32 %s1268_s15, 4  ;;  %s16_s16 = int_to_ptr.vmem [resolvable:$true] %s15_s16 }
   0x2   :  { %s1254_s17 = scalar_lea.vmem %s16_s16, 256  ;;  %p1259_p1 = scmp.lt.s32.totalorder %s16_s16, %s16_s16 }
   0x3   :  { %p1255_p0 = scmp.ne.s32.totalorder %s16_s16, %s1254_s17  ;;  %p1260_p2 = scmp.lt.s32.totalorder %s1254_s17, %s1254_s17 }
   0x5   :  { %p1261_p3 = por %p1260_p2, %p1259_p1 }
   0x7   :  { %p1262_p4 = pnand %p1261_p3, %p1255_p0 }
   0x9   :  { %1265 = shalt.err (!%p1262_p4)
}
   0xa   :  { %s1269_s18 = smov 32   ;;  %s1270_s19 = smov 2  }
   0xb   :  { %21 = dma.hbm_to_vmem [thread:$0]  %s1512_s0, 256, %s16_s16, [#allocation4], %s1269_s18, %s1269_s18, %s1270_s19  }
   0xc   :  { %1266 = dma.done.wait [#allocation4], 256  }
   0xd   :  { %1267 = vsyncadd [#allocation4], 4294967040  ;;  %v1271_v0 = vmov 0.0   ;;  %vm1272_vm0 = vmmov 0   ;;  %v1314_v1 = vld [vmem:[%s1513_s1 + $0x18] sm:$0xff]  ;;  %v1319_v2 = vld [vmem:[%s1513_s1 + $0x10] sm:$0xff] }
   0xe   :  { %1078 = vmatprep.subr.mxu0 %v1271_v0  ;;  %1086 = vmatprep.mubr.msk.f32.mxu0 %vm1272_vm0, %v1271_v0  ;;  %v1327_v3 = vld [vmem:[%s1513_s1 + $0x8] sm:$0xff]  ;;  %v1336_v4 = vld [vmem:[%s1513_s1] sm:$0xff]  ;;  %v31_v5 = vld [vmem:[#allocation3] sm:$0x3]  ;;  %s1273_s1 = smov 64   ;;  %vm36_vm1 = vcmask 261120  }
   0xf   :  { %1089 = vmatprep.subr.mxu1 %v1271_v0  ;;  %1097 = vmatprep.mubr.msk.f32.mxu1 %vm1272_vm0, %v1271_v0  ;;  %v142_v23 = vld [vmem:[#allocation3 + $0x2] sm:$0x3]  ;;  %v253_v41 = vld [vmem:[#allocation3 + $0x4] sm:$0x3]  ;;  %v364_v59 = vld [vmem:[#allocation3 + $0x6] sm:$0x3] }
  0x10   :  { %1079 = vmatpush3.msra.mxu0 %v1314_v1  ;;  %1090 = vmatpush3.msra.mxu1 %v1314_v1  ;;  %s1274_s29 = smov 96   ;;  %vm139_vm2 = vcmask 254976   ;;  %vm1006_vm3 = vcmask 31744  }
  0x11   :  { %1080 = vmatprep.subr.mxu0 %v1271_v0  ;;  %1091 = vmatprep.subr.mxu1 %v1271_v0 }
  0x12   :  { %1081 = vmatpush3.msra.mxu0 %v1319_v2  ;;  %1092 = vmatpush3.msra.mxu1 %v1319_v2 }
  0x13   :  { %1082 = vmatprep.subr.mxu0 %v1271_v0  ;;  %1093 = vmatprep.subr.mxu1 %v1271_v0 }
  0x14   :  { %1083 = vmatpush3.msra.mxu0 %v1327_v3  ;;  %1094 = vmatpush3.msra.mxu1 %v1327_v3 }
  0x15   :  { %1084 = vmatprep.subr.mxu0 %v1271_v0  ;;  %1095 = vmatprep.subr.mxu1 %v1271_v0 }
  0x16   :  { %1085 = vmatpush3.msra.mxu0 %v1336_v4  ;;  %1096 = vmatpush3.msra.mxu1 %v1336_v4 }
  0x17   :  { %1087 = vmatmul.mubr.f32.vlgmr.msra.gmra.mxu0 %v1271_v0  ;;  %1100 = vmatprep.subr.mxu0 %v1271_v0 }
  0x18   :  { %1101 = vmatpush3.msra.mxu0 %v1314_v1  ;;  %1108 = vmatprep.mubr.msk.f32.mxu0 %vm1272_vm0, %v1271_v0 }
  0x19   :  { %1102 = vmatprep.subr.mxu0 %v1271_v0  ;;  %1111 = vmatprep.subr.mxu1 %v1271_v0 }
  0x1a   :  { %1103 = vmatpush3.msra.mxu0 %v1319_v2 }
  0x1b   :  { %1104 = vmatprep.subr.mxu0 %v1271_v0 }
  0x1c   :  { %1105 = vmatpush3.msra.mxu0 %v1327_v3 }
  0x1d   :  { %1106 = vmatprep.subr.mxu0 %v1271_v0 }
  0x1e   :  { %1107 = vmatpush3.msra.mxu0 %v1336_v4 }
  0x1f   :  { %1122 = vmatprep.subr.mxu0 %v1271_v0 }
  0xd7   :  { %v106_v6 = vpop.f32.mrf.mxu0 }
  0xd8   :  { %v110_v7 = vadd.f32 %v106_v6, %v31_v5 }
  0xd9   :  { %v1088_v8 = vpop.f32.mrf.mxu0 }
  0xda   :  { %1184 = vtanh.f32 %v110_v7  ;;  %v1014_v10 = vmul.f32 -1.442695, %v110_v7 }
  0xdc   :  { %1186 = vpow2.f32 %v1014_v10 }
  0xe7   :  { %v1185_v9 = vpop.eup %1184 }
  0xe8   :  { %120 = vrot.lane.b32.xlu0 %v1185_v9, %s1273_s1 }
  0xe9   :  { %v1187_v11 = vpop.eup %1186 }
  0xea   :  { %v114_v12 = vadd.f32 1.0, %v1187_v11 }
  0xec   :  { %1188 = vrcp.f32 %v114_v12 }
  0xf9   :  { %v1189_v13 = vpop.eup %1188 }
  0xfa   :  { %v118_v16 = vmul.f32 0.0, %v1189_v13 }
 0x15a   :  { %v121_v14 = vpop.permute.xlu0 %120 }
 0x15b   :  { %v123_v15 = vmul.f32 %v1189_v13, %v121_v14 }
 0x15d   :  { %125 = vrot.lane.b32.xlu0 %v123_v15, %s1269_s18 }
 0x1cf   :  { %v126_v17 = vpop.permute.xlu0 %125 }
 0x1d0   :  { %v1360_v18 = vadd.f32 %v126_v17, %v118_v16 }
 0x1d2   :  { %1190 = vtanh.f32 %v1360_v18 }
 0x1df   :  { %v1191_v19 = vpop.eup %1190 }
 0x1e0   :  { %131 = vrot.lane.b32.xlu1 %v1191_v19, %s1273_s1  ;;  %v475_v19 = vld [vmem:[#allocation3 + $0x8] sm:$0x3] }
 0x252   :  { %v132_v20 = vpop.permute.xlu1 %131 }
 0x253   :  { %v134_v21 = vmul.f32 %v1189_v13, %v132_v20 }
 0x255   :  { %148 = vrot.lane.b32.xlu1 %v134_v21, %s1269_s18 }
 0x2c7   :  { %v149_v22 = vpop.permute.xlu1 %148 }
 0x2c8   :  { %1098 = vmatmul.mubr.msk.f32.vlgmr.msra.gmra.mxu1 %vm36_vm1, %v149_v22 }
 0x2c9   :  { %1112 = vmatpush3.msra.mxu1 %v1314_v1  ;;  %1119 = vmatprep.mubr.msk.f32.mxu1 %vm1272_vm0, %v1271_v0 }
 0x2ca   :  { %1113 = vmatprep.subr.mxu1 %v1271_v0 }
 0x2cb   :  { %1114 = vmatpush3.msra.mxu1 %v1319_v2 }
 0x2cc   :  { %1115 = vmatprep.subr.mxu1 %v1271_v0 }
 0x2cd   :  { %1116 = vmatpush3.msra.mxu1 %v1327_v3 }
 0x2ce   :  { %1117 = vmatprep.subr.mxu1 %v1271_v0 }
 0x2cf   :  { %1118 = vmatpush3.msra.mxu1 %v1336_v4 }
 0x2d0   :  { %1133 = vmatprep.subr.mxu1 %v1271_v0 }
 0x388   :  { %v218_v24 = vpop.f32.mrf.mxu1 }
 0x389   :  { %v222_v25 = vadd.f32 %v218_v24, %v142_v23 }
 0x38a   :  { %v1099_v26 = vpop.f32.mrf.mxu1 }
 0x38b   :  { %1192 = vtanh.f32 %v222_v25  ;;  %v1016_v28 = vmul.f32 -1.442695, %v222_v25 }
 0x38d   :  { %1194 = vpow2.f32 %v1016_v28 }
 0x398   :  { %v1193_v27 = vpop.eup %1192 }
 0x399   :  { %232 = vrot.lane.b32.xlu0 %v1193_v27, %s1273_s1 }
 0x39a   :  { %v1195_v29 = vpop.eup %1194 }
 0x39b   :  { %v226_v30 = vadd.f32 1.0, %v1195_v29 }
 0x39d   :  { %1196 = vrcp.f32 %v226_v30 }
 0x3aa   :  { %v1197_v31 = vpop.eup %1196 }
 0x3ab   :  { %v230_v34 = vmul.f32 %v1197_v31, %v1360_v18 }
 0x40b   :  { %v233_v32 = vpop.permute.xlu0 %232 }
 0x40c   :  { %v235_v33 = vmul.f32 %v1197_v31, %v233_v32 }
 0x40e   :  { %237 = vrot.lane.b32.xlu1 %v235_v33, %s1269_s18 }
 0x480   :  { %v238_v35 = vpop.permute.xlu1 %237 }
 0x481   :  { %v1379_v36 = vadd.f32 %v238_v35, %v230_v34 }
 0x483   :  { %1198 = vtanh.f32 %v1379_v36 }
 0x490   :  { %v1199_v37 = vpop.eup %1198 }
 0x491   :  { %243 = vrot.lane.b32.xlu0 %v1199_v37, %s1273_s1 }
 0x503   :  { %v244_v38 = vpop.permute.xlu0 %243 }
 0x504   :  { %v246_v39 = vmul.f32 %v1197_v31, %v244_v38  ;;  %v586_v38 = vld [vmem:[#allocation3 + $0xa] sm:$0x3] }
 0x506   :  { %259 = vrot.lane.b32.xlu1 %v246_v39, %s1269_s18 }
 0x578   :  { %v260_v40 = vpop.permute.xlu1 %259 }
 0x579   :  { %1109 = vmatmul.mubr.msk.f32.vlgmr.msra.gmra.mxu0 %vm36_vm1, %v260_v40 }
 0x57a   :  { %1123 = vmatpush3.msra.mxu0 %v1314_v1  ;;  %1130 = vmatprep.mubr.msk.f32.mxu0 %vm1272_vm0, %v1271_v0 }
 0x57b   :  { %1124 = vmatprep.subr.mxu0 %v1271_v0 }
 0x57c   :  { %1125 = vmatpush3.msra.mxu0 %v1319_v2 }
 0x57d   :  { %1126 = vmatprep.subr.mxu0 %v1271_v0 }
 0x57e   :  { %1127 = vmatpush3.msra.mxu0 %v1327_v3 }
 0x57f   :  { %1128 = vmatprep.subr.mxu0 %v1271_v0 }
 0x580   :  { %1129 = vmatpush3.msra.mxu0 %v1336_v4 }
 0x581   :  { %1144 = vmatprep.subr.mxu0 %v1271_v0 }
 0x639   :  { %v329_v42 = vpop.f32.mrf.mxu0 }
 0x63a   :  { %v333_v43 = vadd.f32 %v329_v42, %v253_v41 }
 0x63b   :  { %v1110_v44 = vpop.f32.mrf.mxu0 }
 0x63c   :  { %1200 = vtanh.f32 %v333_v43  ;;  %v1018_v46 = vmul.f32 -1.442695, %v333_v43 }
 0x63e   :  { %1202 = vpow2.f32 %v1018_v46 }
 0x649   :  { %v1201_v45 = vpop.eup %1200 }
 0x64a   :  { %343 = vrot.lane.b32.xlu0 %v1201_v45, %s1273_s1 }
 0x64b   :  { %v1203_v47 = vpop.eup %1202 }
 0x64c   :  { %v337_v48 = vadd.f32 1.0, %v1203_v47 }
 0x64e   :  { %1204 = vrcp.f32 %v337_v48 }
 0x65b   :  { %v1205_v49 = vpop.eup %1204 }
 0x65c   :  { %v341_v52 = vmul.f32 %v1205_v49, %v1379_v36 }
 0x6bc   :  { %v344_v50 = vpop.permute.xlu0 %343 }
 0x6bd   :  { %v346_v51 = vmul.f32 %v1205_v49, %v344_v50 }
 0x6bf   :  { %348 = vrot.lane.b32.xlu1 %v346_v51, %s1269_s18  ;;  %v697_v51 = vld [vmem:[#allocation3 + $0xc] sm:$0x3] }
 0x731   :  { %v349_v53 = vpop.permute.xlu1 %348 }
 0x732   :  { %v1398_v54 = vadd.f32 %v349_v53, %v341_v52 }
 0x734   :  { %1206 = vtanh.f32 %v1398_v54 }
 0x741   :  { %v1207_v55 = vpop.eup %1206 }
 0x742   :  { %354 = vrot.lane.b32.xlu0 %v1207_v55, %s1273_s1 }
 0x7b4   :  { %v355_v56 = vpop.permute.xlu0 %354 }
 0x7b5   :  { %v357_v57 = vmul.f32 %v1205_v49, %v355_v56 }
 0x7b7   :  { %370 = vrot.lane.b32.xlu1 %v357_v57, %s1269_s18 }
 0x829   :  { %v371_v58 = vpop.permute.xlu1 %370 }
 0x82a   :  { %1120 = vmatmul.mubr.msk.f32.vlgmr.msra.gmra.mxu1 %vm36_vm1, %v371_v58 }
 0x82b   :  { %1134 = vmatpush3.msra.mxu1 %v1314_v1  ;;  %1141 = vmatprep.mubr.msk.f32.mxu1 %vm1272_vm0, %v1271_v0 }
 0x82c   :  { %1135 = vmatprep.subr.mxu1 %v1271_v0 }
 0x82d   :  { %1136 = vmatpush3.msra.mxu1 %v1319_v2 }
 0x82e   :  { %1137 = vmatprep.subr.mxu1 %v1271_v0 }
 0x82f   :  { %1138 = vmatpush3.msra.mxu1 %v1327_v3 }
 0x830   :  { %1139 = vmatprep.subr.mxu1 %v1271_v0 }
 0x831   :  { %1140 = vmatpush3.msra.mxu1 %v1336_v4 }
 0x832   :  { %1155 = vmatprep.subr.mxu1 %v1271_v0 }
 0x8ea   :  { %v440_v60 = vpop.f32.mrf.mxu1 }
 0x8eb   :  { %v444_v61 = vadd.f32 %v440_v60, %v364_v59 }
 0x8ec   :  { %v1121_v62 = vpop.f32.mrf.mxu1 }
 0x8ed   :  { %1208 = vtanh.f32 %v444_v61  ;;  %v1020_v5 = vmul.f32 -1.442695, %v444_v61 }
 0x8ef   :  { %1210 = vpow2.f32 %v1020_v5 }
 0x8fa   :  { %v1209_v63 = vpop.eup %1208 }
 0x8fb   :  { %454 = vrot.lane.b32.xlu0 %v1209_v63, %s1273_s1 }
 0x8fc   :  { %v1211_v6 = vpop.eup %1210 }
 0x8fd   :  { %v448_v7 = vadd.f32 1.0, %v1211_v6 }
 0x8ff   :  { %1212 = vrcp.f32 %v448_v7 }
 0x90c   :  { %v1213_v8 = vpop.eup %1212 }
 0x90d   :  { %v452_v11 = vmul.f32 %v1213_v8, %v1398_v54 }
 0x96d   :  { %v455_v9 = vpop.permute.xlu0 %454 }
 0x96e   :  { %v457_v10 = vmul.f32 %v1213_v8, %v455_v9 }
 0x970   :  { %459 = vrot.lane.b32.xlu1 %v457_v10, %s1269_s18 }
 0x9e2   :  { %v460_v12 = vpop.permute.xlu1 %459 }
 0x9e3   :  { %v1417_v13 = vadd.f32 %v460_v12, %v452_v11  ;;  %v808_v11 = vld [vmem:[#allocation3 + $0xe] sm:$0x3] }
 0x9e5   :  { %1214 = vtanh.f32 %v1417_v13 }
 0x9f2   :  { %v1215_v14 = vpop.eup %1214 }
 0x9f3   :  { %465 = vrot.lane.b32.xlu0 %v1215_v14, %s1273_s1 }
 0xa65   :  { %v466_v15 = vpop.permute.xlu0 %465 }
 0xa66   :  { %v468_v16 = vmul.f32 %v1213_v8, %v466_v15 }
 0xa68   :  { %481 = vrot.lane.b32.xlu1 %v468_v16, %s1269_s18 }
 0xada   :  { %v482_v17 = vpop.permute.xlu1 %481 }
 0xadb   :  { %1131 = vmatmul.mubr.msk.f32.vlgmr.msra.gmra.mxu0 %vm36_vm1, %v482_v17 }
 0xadc   :  { %1145 = vmatpush3.msra.mxu0 %v1314_v1  ;;  %1152 = vmatprep.mubr.msk.f32.mxu0 %vm1272_vm0, %v1271_v0 }
 0xadd   :  { %1146 = vmatprep.subr.mxu0 %v1271_v0 }
 0xade   :  { %1147 = vmatpush3.msra.mxu0 %v1319_v2 }
 0xadf   :  { %1148 = vmatprep.subr.mxu0 %v1271_v0 }
 0xae0   :  { %1149 = vmatpush3.msra.mxu0 %v1327_v3 }
 0xae1   :  { %1150 = vmatprep.subr.mxu0 %v1271_v0 }
 0xae2   :  { %1151 = vmatpush3.msra.mxu0 %v1336_v4 }
 0xb9b   :  { %v551_v20 = vpop.f32.mrf.mxu0 }
 0xb9c   :  { %v555_v21 = vadd.f32 %v551_v20, %v475_v19 }
 0xb9d   :  { %v1132_v22 = vpop.f32.mrf.mxu0 }
 0xb9e   :  { %1216 = vtanh.f32 %v555_v21  ;;  %v1022_v24 = vmul.f32 -1.442695, %v555_v21 }
 0xba0   :  { %1218 = vpow2.f32 %v1022_v24 }
 0xbab   :  { %v1217_v23 = vpop.eup %1216 }
 0xbac   :  { %565 = vrot.lane.b32.xlu0 %v1217_v23, %s1273_s1 }
 0xbad   :  { %v1219_v25 = vpop.eup %1218 }
 0xbae   :  { %v559_v26 = vadd.f32 1.0, %v1219_v25 }
 0xbb0   :  { %1220 = vrcp.f32 %v559_v26  ;;  %v917_v26 = vld [vmem:[%s1514_s2 + $0x18] sm:$0xff] }
 0xbb1   :  { %1166 = vmatprep.subr.mxu0 %v917_v26 }
 0xbbd   :  { %v1221_v27 = vpop.eup %1220 }
 0xbbe   :  { %v563_v30 = vmul.f32 %v1221_v27, %v1417_v13 }
 0xc1e   :  { %v566_v28 = vpop.permute.xlu0 %565 }
 0xc1f   :  { %v568_v29 = vmul.f32 %v1221_v27, %v566_v28 }
 0xc21   :  { %570 = vrot.lane.b32.xlu1 %v568_v29, %s1269_s18 }
 0xc93   :  { %v571_v31 = vpop.permute.xlu1 %570 }
 0xc94   :  { %v1435_v32 = vadd.f32 %v571_v31, %v563_v30 }
 0xc96   :  { %1222 = vtanh.f32 %v1435_v32 }
 0xca3   :  { %v1223_v33 = vpop.eup %1222 }
 0xca4   :  { %576 = vrot.lane.b32.xlu0 %v1223_v33, %s1273_s1 }
 0xd16   :  { %v577_v34 = vpop.permute.xlu0 %576 }
 0xd17   :  { %v579_v35 = vmul.f32 %v1221_v27, %v577_v34  ;;  %v914_v27 = vld [vmem:[%s1514_s2] sm:$0xff] }
 0xd19   :  { %592 = vrot.lane.b32.xlu1 %v579_v35, %s1269_s18 }
 0xd8b   :  { %v593_v37 = vpop.permute.xlu1 %592 }
 0xd8c   :  { %1142 = vmatmul.mubr.msk.f32.vlgmr.msra.gmra.mxu1 %vm36_vm1, %v593_v37 }
 0xd8d   :  { %1156 = vmatpush3.msra.mxu1 %v1314_v1  ;;  %1163 = vmatprep.mubr.msk.f32.mxu1 %vm1272_vm0, %v1271_v0 }
 0xd8e   :  { %1157 = vmatprep.subr.mxu1 %v1271_v0 }
 0xd8f   :  { %1158 = vmatpush3.msra.mxu1 %v1319_v2 }
 0xd90   :  { %1159 = vmatprep.subr.mxu1 %v1271_v0 }
 0xd91   :  { %1160 = vmatpush3.msra.mxu1 %v1327_v3 }
 0xd92   :  { %1161 = vmatprep.subr.mxu1 %v1271_v0 }
 0xd93   :  { %1162 = vmatpush3.msra.mxu1 %v1336_v4 }
 0xe4c   :  { %v662_v39 = vpop.f32.mrf.mxu1 }
 0xe4d   :  { %v666_v40 = vadd.f32 %v662_v39, %v586_v38  ;;  %v1029_v38 = vld [vmem:[%s1515_s3] ss:$0 sm:$0xff] }
 0xe4e   :  { %v1143_v41 = vpop.f32.mrf.mxu1 }
 0xe4f   :  { %1224 = vtanh.f32 %v666_v40  ;;  %v1024_v42 = vmul.f32 -1.442695, %v666_v40 }
 0xe51   :  { %1226 = vpow2.f32 %v1024_v42 }
 0xe5c   :  { %v1225_v1 = vpop.eup %1224 }
 0xe5d   :  { %676 = vrot.lane.b32.xlu0 %v1225_v1, %s1273_s1 }
 0xe5e   :  { %v1227_v43 = vpop.eup %1226 }
 0xe5f   :  { %v670_v2 = vadd.f32 1.0, %v1227_v43 }
 0xe61   :  { %1228 = vrcp.f32 %v670_v2 }
 0xe6e   :  { %v1229_v44 = vpop.eup %1228 }
 0xe6f   :  { %v674_v0 = vmul.f32 %v1229_v44, %v1435_v32 }
 0xecf   :  { %v677_v45 = vpop.permute.xlu0 %676 }
 0xed0   :  { %v679_v3 = vmul.f32 %v1229_v44, %v677_v45 }
 0xed2   :  { %681 = vrot.lane.b32.xlu1 %v679_v3, %s1269_s18 }
 0xf44   :  { %v682_v4 = vpop.permute.xlu1 %681 }
 0xf45   :  { %v1453_v46 = vadd.f32 %v682_v4, %v674_v0 }
 0xf47   :  { %1230 = vtanh.f32 %v1453_v46 }
 0xf54   :  { %v1231_v47 = vpop.eup %1230 }
 0xf55   :  { %687 = vrot.lane.b32.xlu0 %v1231_v47, %s1273_s1 }
 0xfc7   :  { %v688_v48 = vpop.permute.xlu0 %687 }
 0xfc8   :  { %v690_v49 = vmul.f32 %v1229_v44, %v688_v48 }
 0xfca   :  { %703 = vrot.lane.b32.xlu1 %v690_v49, %s1269_s18 }
0x103c   :  { %v704_v50 = vpop.permute.xlu1 %703 }
0x103d   :  { %1153 = vmatmul.mubr.msk.f32.vlgmr.msra.gmra.mxu0 %vm36_vm1, %v704_v50 }
0x103e   :  { %1167 = vmatpush3.msra.mxu0 %v917_v26 }
0x10fd   :  { %v773_v52 = vpop.f32.mrf.mxu0 }
0x10fe   :  { %v777_v53 = vadd.f32 %v773_v52, %v697_v51 }
0x10ff   :  { %v1154_v55 = vpop.f32.mrf.mxu0 }
0x1100   :  { %1232 = vtanh.f32 %v777_v53  ;;  %v1026_v57 = vmul.f32 -1.442695, %v777_v53 }
0x1102   :  { %1234 = vpow2.f32 %v1026_v57 }
0x110d   :  { %v1233_v56 = vpop.eup %1232 }
0x110e   :  { %787 = vrot.lane.b32.xlu0 %v1233_v56, %s1273_s1 }
0x110f   :  { %v1235_v58 = vpop.eup %1234 }
0x1110   :  { %v781_v59 = vadd.f32 1.0, %v1235_v58 }
0x1112   :  { %1236 = vrcp.f32 %v781_v59 }
0x111f   :  { %v1237_v60 = vpop.eup %1236 }
0x1120   :  { %v785_v63 = vmul.f32 %v1237_v60, %v1453_v46 }
0x1180   :  { %v788_v61 = vpop.permute.xlu0 %787 }
0x1181   :  { %v790_v62 = vmul.f32 %v1237_v60, %v788_v61 }
0x1183   :  { %792 = vrot.lane.b32.xlu1 %v790_v62, %s1269_s18 }
0x11f5   :  { %v793_v5 = vpop.permute.xlu1 %792 }
0x11f6   :  { %v795_v6 = vadd.f32 %v793_v5, %v785_v63 }
0x11f8   :  { %1238 = vtanh.f32 %v795_v6 }
0x1205   :  { %v1239_v7 = vpop.eup %1238 }
0x1206   :  { %798 = vrot.lane.b32.xlu0 %v1239_v7, %s1273_s1 }
0x1278   :  { %v799_v8 = vpop.permute.xlu0 %798 }
0x1279   :  { %v801_v9 = vmul.f32 %v1237_v60, %v799_v8 }
0x127b   :  { %814 = vrot.lane.b32.xlu1 %v801_v9, %s1269_s18 }
0x12ed   :  { %v815_v10 = vpop.permute.xlu1 %814 }
0x12ee   :  { %1164 = vmatmul.mubr.msk.f32.vlgmr.msra.gmra.mxu1 %vm36_vm1, %v815_v10 }
0x13ae   :  { %v884_v12 = vpop.f32.mrf.mxu1 }
0x13af   :  { %v888_v14 = vadd.f32 %v884_v12, %v808_v11 }
0x13b0   :  { %v1165_v15 = vpop.f32.mrf.mxu1 }
0x13b1   :  { %1240 = vtanh.f32 %v888_v14  ;;  %v1028_v17 = vmul.f32 -1.442695, %v888_v14 }
0x13b3   :  { %1242 = vpow2.f32 %v1028_v17 }
0x13be   :  { %v1241_v16 = vpop.eup %1240 }
0x13bf   :  { %898 = vrot.lane.b32.xlu0 %v1241_v16, %s1273_s1 }
0x13c0   :  { %v1243_v19 = vpop.eup %1242 }
0x13c1   :  { %v892_v20 = vadd.f32 1.0, %v1243_v19 }
0x13c3   :  { %136 = vrot.lane.b32.xlu0 %v1360_v18, %s1274_s29  ;;  %1244 = vrcp.f32 %v892_v20 }
0x13c7   :  { %359 = vrot.lane.b32.xlu0 %v1398_v54, %s1274_s29 }
0x13cb   :  { %581 = vrot.lane.b32.xlu0 %v1435_v32, %s1274_s29 }
0x13cf   :  { %803 = vrot.lane.b32.xlu0 %v795_v6, %s1274_s29 }
0x13d0   :  { %v1245_v21 = vpop.eup %1244 }
0x13d1   :  { %v896_v28 = vmul.f32 %v1245_v21, %v795_v6 }
0x1431   :  { %v899_v22 = vpop.permute.xlu0 %898 }
0x1432   :  { %v901_v23 = vmul.f32 %v1245_v21, %v899_v22 }
0x1434   :  { %903 = vrot.lane.b32.xlu1 %v901_v23, %s1269_s18 }
0x1435   :  { %v137_v18 = vpop.permute.xlu0 %136 }
0x1436   :  { %140 = vst.msk [vmem:[#allocation2] sm:$0x3] %vm139_vm2, %v137_v18 }
0x1438   :  { %248 = vrot.lane.b32.xlu1 %v1379_v36, %s1274_s29  ;;  %v916_v36 = vld [vmem:[%s1514_s2 + $0x10] sm:$0xff] }
0x1439   :  { %v360_v54 = vpop.permute.xlu0 %359  ;;  %1168 = vmatprep.subr.mxu0 %v916_v36 }
0x143a   :  { %362 = vst.msk [vmem:[#allocation2 + $0x4] sm:$0x3] %vm139_vm2, %v360_v54  ;;  %1169 = vmatpush3.msra.mxu0 %v916_v36 }
0x143c   :  { %470 = vrot.lane.b32.xlu1 %v1417_v13, %s1274_s29  ;;  %v915_v13 = vld [vmem:[%s1514_s2 + $0x8] sm:$0xff] }
0x143d   :  { %v582_v24 = vpop.permute.xlu0 %581  ;;  %1170 = vmatprep.subr.mxu0 %v915_v13 }
0x143e   :  { %584 = vst.msk [vmem:[#allocation2 + $0x8] sm:$0x3] %vm139_vm2, %v582_v24  ;;  %1171 = vmatpush3.msra.mxu0 %v915_v13 }
0x143f   :  { %1172 = vmatprep.subr.mxu0 %v914_v27 }
0x1440   :  { %692 = vrot.lane.b32.xlu1 %v1453_v46, %s1274_s29  ;;  %1173 = vmatpush3.msra.mxu0 %v914_v27 }
0x1441   :  { %v804_v25 = vpop.permute.xlu0 %803 }
0x1442   :  { %806 = vst.msk [vmem:[#allocation2 + $0xc] sm:$0x3] %vm139_vm2, %v804_v25 }
0x14a6   :  { %v904_v29 = vpop.permute.xlu1 %903 }
0x14a7   :  { %v906_v30 = vadd.f32 %v904_v29, %v896_v28 }
0x14a9   :  { %908 = vrot.lane.b32.xlu1 %v906_v30, %s1274_s29 }
0x14aa   :  { %v249_v31 = vpop.permute.xlu1 %248 }
0x14ab   :  { %251 = vst.msk [vmem:[#allocation2 + $0x2] sm:$0x3] %vm139_vm2, %v249_v31 }
0x14ae   :  { %v471_v32 = vpop.permute.xlu1 %470 }
0x14af   :  { %473 = vst.msk [vmem:[#allocation2 + $0x6] sm:$0x3] %vm139_vm2, %v471_v32 }
0x14b2   :  { %v693_v33 = vpop.permute.xlu1 %692 }
0x14b3   :  { %695 = vst.msk [vmem:[#allocation2 + $0xa] sm:$0x3] %vm139_vm2, %v693_v33 }
0x14b6   :  { %v912_v34 = vld [vmem:[#allocation2] sm:$0xff] }
0x14b7   :  { %1174 = vmatprep.mubr.msk.f32.mxu0 %vm36_vm1, %v912_v34 }
0x151b   :  { %v909_v35 = vpop.permute.xlu1 %908 }
0x151c   :  { %911 = vst.msk [vmem:[#allocation2 + $0xe] sm:$0x3] %vm139_vm2, %v909_v35 }
0x1523   :  { %v913_v37 = vld [vmem:[#allocation2 + $0x8] sm:$0xff] }
0x1524   :  { %1175 = vmatmul.mubr.msk.f32.vlgmr.msra.gmra.mxu0 %vm36_vm1, %v913_v37 }
0x15e4   :  { %v1176_v39 = vpop.f32.mrf.mxu0 }
0x15e5   :  { %v1003_v40 = vadd.f32 %v1176_v39, %v1029_v38 }
0x15e6   :  { %v997_v41 = vpop.f32.mrf.mxu0 }
0x15e7   :  { %1008 = vst.msk [vmem:[%s1516_s4 + $0x8] sm:$0xff] %vm1006_vm3, %v1003_v40  ;;  %v998_v1 = vadd.f32 %v1029_v38, %v997_v41 }
0x15e9   :  { %1007 = vst.msk [vmem:[%s1516_s4] sm:$0xff] %vm1006_vm3, %v998_v1 }
0x15ea   :  { %1013 = vsyncpa [#allocation4], 1 }

</bundles_post_ra>
